<compile_context>
chip_gen: v7x
topology: tpu7x:2x2x1
jax: 0.10.0
libtpu: 0.0.40
codegen_flags: <defaults>
</compile_context>

<pallas_src>
import functools

import jax
import jax.numpy as jnp
from jax.experimental import pallas as pl
from jax.experimental.pallas import tpu as pltpu

WORD_DIM = 15
OUT_FEATURES = 20
NUM_CLASSES = 6
LANE_PAD = 128           # lane-dense output / fc padding width
NEG_MASK = -1e30         # fill for padded logit lanes / padded conv columns


def _round_up(x, m):
    return (x + m - 1) // m * m


def cnn_kernel(x_ref, wexp_ref, wfc1_ref, wfc2_ref, bfc_ref, out_ref,
               *, n_pos1, n_pos2):
    """Fused conv1d(3/4-gram) + relu + global maxpool + fc + softmax.

    x_ref:    (B_TILE, K_pad)  bf16  flattened embeddings, col K = 1.0 (bias)
    wexp_ref: (K_pad, N_pad)   bf16  block-banded conv filters; row K holds
                                     the folded biases (-1e30 on pad columns)
    wfc1/2:   (20, 128)        bf16  fc weight halves (zero-padded lanes)
    bfc_ref:  (1, 128)         f32   fc bias, padded lanes = NEG_MASK
    out_ref:  (B_TILE, 128)    f32   softmax probs (cols >= NUM_CLASSES ~ 0)
    """
    F = OUT_FEATURES

    # One bf16 MXU pass covers every window position of both ngram banks,
    # bias included (via the constant-1 column of x).
    h = jnp.dot(x_ref[...], wexp_ref[...], preferred_element_type=jnp.float32)

    def pooled(base, n_pos):
        # Global max-pool over window positions (static, small trip count).
        # Bias is already folded in; relu hoisted below (monotone).
        # TODO(synk): at large L switch to a log-tree reduction with per-bank
        # lane padding (roll wrap-around must not cross bank boundaries).
        acc = h[:, base:base + F]
        for t in range(1, n_pos):
            acc = jnp.maximum(acc, h[:, base + t * F: base + (t + 1) * F])
        return acc

    c1 = jnp.maximum(pooled(0, n_pos1), 0.0).astype(jnp.bfloat16)          # (B, 20)
    c2 = jnp.maximum(pooled(n_pos1 * F, n_pos2), 0.0).astype(jnp.bfloat16) # (B, 20)

    # fc over concat([c1, c2], 1) done as a split matmul (avoids lane concat).
    logits = (jnp.dot(c1, wfc1_ref[...], preferred_element_type=jnp.float32)
              + jnp.dot(c2, wfc2_ref[...], preferred_element_type=jnp.float32)
              + bfc_ref[...])                                              # (B, 128)

    # Softmax over dim=1. Padded lanes carry NEG_MASK -> exp underflows to 0.
    m = jnp.max(logits, axis=1, keepdims=True)
    e = jnp.exp(logits - m)
    denom = jnp.sum(e, axis=1, keepdims=True)
    out_ref[...] = e * pl.reciprocal(denom, approx=True)


def init_params(key, vocab_size, max_comment_length):
    """Deterministic parameter init matching the PyTorch module's shapes."""
    del max_comment_length
    k_emb, k_w1, k_b1, k_w2, k_b2, k_wfc, k_bfc = jax.random.split(key, 7)
    n_emb_rows = vocab_size + 1
    padding_idx = vocab_size

    embedding = jax.random.normal(k_emb, (n_emb_rows, WORD_DIM), jnp.float32)
    embedding = embedding.at[padding_idx].set(0.0)   # padding_idx row is zero

    def uniform(k, shape, fan_in):
        bound = 1.0 / jnp.sqrt(float(fan_in))
        return jax.random.uniform(k, shape, jnp.float32, -bound, bound)

    # PyTorch Conv1d weight is (out, in=1, ksize); we store (ksize, out).
    w1 = uniform(k_w1, (3 * WORD_DIM, OUT_FEATURES), 3 * WORD_DIM)
    b1 = uniform(k_b1, (1, OUT_FEATURES), 3 * WORD_DIM)
    w2 = uniform(k_w2, (4 * WORD_DIM, OUT_FEATURES), 4 * WORD_DIM)
    b2 = uniform(k_b2, (1, OUT_FEATURES), 4 * WORD_DIM)
    # PyTorch Linear weight is (6, 40); we store (40, 6).
    wfc = uniform(k_wfc, (2 * OUT_FEATURES, NUM_CLASSES), 2 * OUT_FEATURES)
    bfc = uniform(k_bfc, (1, NUM_CLASSES), 2 * OUT_FEATURES)

    return dict(embedding=embedding, w1=w1, b1=b1, w2=w2, b2=b2,
                wfc=wfc, bfc=bfc)


def prepare_kernel_params(params, max_comment_length):
    """One-time expansion / padding of weights into kernel-friendly layouts."""
    L = max_comment_length
    if L < 4:
        raise ValueError("max_comment_length must be >= 4 for the 4-gram conv")
    F = OUT_FEATURES
    n1, n2 = L - 3 + 1, L - 4 + 1
    K = WORD_DIM * L
    K_pad = _round_up(K + 1, 128)            # +1: constant-1 row (folded bias)
    N_valid = (n1 + n2) * F
    N_pad = _round_up(N_valid, 128)          # lane dim of expanded weight

    # Block-banded expanded conv weight: x @ w_exp computes every window
    # position of both ngram banks (bias included) in one MXU matmul.
    w_exp = jnp.zeros((K_pad, N_pad), jnp.float32)
    for t in range(n1):
        w_exp = w_exp.at[t * WORD_DIM: t * WORD_DIM + 3 * WORD_DIM,
                         t * F:(t + 1) * F].set(params["w1"])
    off = n1 * F
    for t in range(n2):
        w_exp = w_exp.at[t * WORD_DIM: t * WORD_DIM + 4 * WORD_DIM,
                         off + t * F: off + (t + 1) * F].set(params["w2"])
    # Bias row (multiplied by the constant-1 column of x). Padded columns get
    # NEG_MASK so nothing downstream can pick up spurious zeros.
    bias_row = jnp.full((N_pad,), NEG_MASK, jnp.float32)
    bias_row = bias_row.at[:n1 * F].set(jnp.tile(params["b1"][0], n1))
    bias_row = bias_row.at[n1 * F:N_valid].set(jnp.tile(params["b2"][0], n2))
    w_exp = w_exp.at[K, :].set(bias_row)

    wfc = params["wfc"]                                          # (40, 6)
    wfc1 = jnp.zeros((F, LANE_PAD), jnp.float32).at[:, :NUM_CLASSES].set(wfc[:F])
    wfc2 = jnp.zeros((F, LANE_PAD), jnp.float32).at[:, :NUM_CLASSES].set(wfc[F:])
    bfc = (jnp.full((1, LANE_PAD), NEG_MASK, jnp.float32)
           .at[:, :NUM_CLASSES].set(params["bfc"]))

    # bf16 matmul operands (f32 accumulation in-kernel); fc bias stays f32.
    return dict(embedding=params["embedding"],
                w_exp=w_exp.astype(jnp.bfloat16),
                wfc1=wfc1.astype(jnp.bfloat16),
                wfc2=wfc2.astype(jnp.bfloat16),
                bfc=bfc)


def _invariant_spec(shape):
    """BlockSpec for grid-invariant operands: single-buffered if supported."""
    idx = lambda i: (0, 0)
    try:
        return pl.BlockSpec(shape, idx, pipeline_mode=pl.Buffered(1))
    except (AttributeError, TypeError):      # older jax without pipeline_mode
        return pl.BlockSpec(shape, idx)


@functools.partial(jax.jit, static_argnames=("max_comment_length",))
def cnn_forward(tokens, kparams, max_comment_length):
    L = max_comment_length
    B = tokens.shape[0]
    F = OUT_FEATURES
    n1, n2 = L - 3 + 1, L - 4 + 1
    K = WORD_DIM * L
    K_pad, N_pad = kparams["w_exp"].shape

    # Embedding gather kept as plain-JAX glue (B is tiny here); see TODO above.
    emb = jnp.take(kparams["embedding"], tokens, axis=0)         # (B, L, 15)
    ones = jnp.ones((B, 1), jnp.float32)                         # folded-bias lane
    x = jnp.concatenate([emb.reshape(B, K), ones], axis=1).astype(jnp.bfloat16)

    # Batch tile: multiple of 16 (bf16 sublane packing).  Mid-size B -> >= 2
    # tiles so the "parallel" axis shards across v7x's two TCs; big B -> 256
    # rows to fill the 2x256 MXU on v6e/v7x (v5e is already full at 128).
    B16 = _round_up(B, 16)
    if B16 >= 512:
        B_TILE = 256
    elif B16 >= 32:
        B_TILE = min(128, _round_up(pl.cdiv(B16, 2), 16))
    else:
        B_TILE = B16
    B_pad = _round_up(B, B_TILE)
    x = jnp.pad(x, ((0, B_pad - B), (0, K_pad - (K + 1))))

    kernel = functools.partial(cnn_kernel, n_pos1=n1, n_pos2=n2)

    # VMEM budget from actual buffers (x/out double-buffered, weights single).
    est = (2 * B_TILE * K_pad * 2            # x blocks (bf16)
           + K_pad * N_pad * 2               # w_exp (bf16, single buffer)
           + 2 * F * LANE_PAD * 2            # fc weight halves (bf16)
           + 8 * LANE_PAD * 4                # fc bias (f32, sublane-padded)
           + 2 * B_TILE * LANE_PAD * 4       # out blocks (f32)
           + B_TILE * N_pad * 4)             # matmul result live values
    vmem_limit = int(min(64 << 20, max(16 << 20, 2 * est + (2 << 20))))

    out = pl.pallas_call(
        kernel,
        out_shape=jax.ShapeDtypeStruct((B_pad, LANE_PAD), jnp.float32),
        grid=(B_pad // B_TILE,),
        in_specs=[
            pl.BlockSpec((B_TILE, K_pad), lambda i: (i, 0)),   # x (pipelined)
            _invariant_spec((K_pad, N_pad)),                   # expanded conv w
            _invariant_spec((F, LANE_PAD)),                    # fc weight half 1
            _invariant_spec((F, LANE_PAD)),                    # fc weight half 2
            _invariant_spec((1, LANE_PAD)),                    # fc bias (masked)
        ],
        out_specs=pl.BlockSpec((B_TILE, LANE_PAD), lambda i: (i, 0)),
        compiler_params=pltpu.CompilerParams(
            dimension_semantics=("parallel",),                 # v7x: 2 TCs
            vmem_limit_bytes=vmem_limit),
        cost_estimate=pl.CostEstimate(
            flops=2 * B_pad * K_pad * N_pad + 4 * B_pad * F * LANE_PAD,
            transcendentals=B_pad * LANE_PAD,
            bytes_accessed=(2 * (B_pad * K_pad + K_pad * N_pad
                                 + 2 * F * LANE_PAD)
                            + 4 * (LANE_PAD + B_pad * LANE_PAD))),
    )(x, kparams["w_exp"], kparams["wfc1"], kparams["wfc2"], kparams["bfc"])

    return out[:B, :NUM_CLASSES]


def cnn_reference(tokens, params, max_comment_length):
    """Pure-JAX (f32) reference of the PyTorch forward for correctness checks."""
    B = tokens.shape[0]
    emb = jnp.take(params["embedding"], tokens, axis=0)
    x = emb.reshape(B, WORD_DIM * max_comment_length)

    def conv_pool(ngram, w, b):
        ks = ngram * WORD_DIM
        n = max_comment_length - ngram + 1
        s = jnp.stack([x[:, t * WORD_DIM: t * WORD_DIM + ks] @ w + b
                       for t in range(n)], axis=1)
        return jnp.max(jax.nn.relu(s), axis=1)

    c = jnp.concatenate([conv_pool(3, params["w1"], params["b1"]),
                         conv_pool(4, params["w2"], params["b2"])], axis=1)
    logits = c @ params["wfc"] + params["bfc"]
    return jax.nn.softmax(logits, axis=1)


if __name__ == "__main__":
    VOCAB_SIZE = 50            # len(dictionary)
    MAX_COMMENT_LENGTH = 8     # L
    BATCH = 2

    key = jax.random.PRNGKey(0)
    k_params, k_tokens = jax.random.split(key)
    params = init_params(k_params, VOCAB_SIZE, MAX_COMMENT_LENGTH)
    kparams = prepare_kernel_params(params, MAX_COMMENT_LENGTH)
    tokens = jax.random.randint(
        k_tokens, (BATCH, MAX_COMMENT_LENGTH), 0, VOCAB_SIZE + 1, jnp.int32)

    out = cnn_forward(tokens, kparams, MAX_COMMENT_LENGTH)
    out = jax.block_until_ready(out)

    assert out.shape == (BATCH, NUM_CLASSES)
    assert bool(jnp.all(jnp.isfinite(out)))
    # Softmax rows must sum to ~1 (approx reciprocal in the epilogue).
    assert bool(jnp.allclose(jnp.sum(out, axis=1), 1.0, atol=5e-3))
    # Match the pure-JAX f32 reference (bf16 matmul operands -> 1e-2 atol).
    ref = cnn_reference(tokens, params, MAX_COMMENT_LENGTH)
    assert bool(jnp.allclose(out, ref, atol=1e-2))
    print("KERNEL_OK")
</pallas_src>

<mosaic_0001>
module attributes {stable_mosaic.version = 11 : i64} {
  func.func @cnn_kernel(%arg0: i32, %arg1: memref<16x128xbf16, #tpu.memory_space<vmem>>, %arg2: memref<128x256xbf16, #tpu.memory_space<vmem>>, %arg3: memref<20x128xbf16, #tpu.memory_space<vmem>>, %arg4: memref<20x128xbf16, #tpu.memory_space<vmem>>, %arg5: memref<1x128xf32, #tpu.memory_space<vmem>>, %arg6: memref<16x128xf32, #tpu.memory_space<vmem>>) attributes {dimension_semantics = [#tpu.dimension_semantics<parallel>], iteration_bounds = array<i64: 1>, scalar_prefetch = 0 : i64, scratch_operands = 0 : i64, tpu.core_type = #tpu.core_type<tc>, window_params = [{transform_indices = @transform_0, window_bounds = array<i64: 16, 128>}, {pipeline_mode = #tpu.pipeline_mode<synchronous>, transform_indices = @transform_1, window_bounds = array<i64: 128, 256>}, {pipeline_mode = #tpu.pipeline_mode<synchronous>, transform_indices = @transform_2, window_bounds = array<i64: 20, 128>}, {pipeline_mode = #tpu.pipeline_mode<synchronous>, transform_indices = @transform_3, window_bounds = array<i64: 20, 128>}, {pipeline_mode = #tpu.pipeline_mode<synchronous>, transform_indices = @transform_4, window_bounds = array<i64: 1, 128>}, {transform_indices = @transform_5, window_bounds = array<i64: 16, 128>}]} {
    %c0 = arith.constant 0 : index
    %c0_0 = arith.constant 0 : index
    %0 = vector.load %arg1[%c0, %c0_0] : memref<16x128xbf16, #tpu.memory_space<vmem>>, vector<16x128xbf16>
    %c0_1 = arith.constant 0 : index
    %c0_2 = arith.constant 0 : index
    %1 = vector.load %arg2[%c0_1, %c0_2] : memref<128x256xbf16, #tpu.memory_space<vmem>>, vector<128x256xbf16>
    %cst = arith.constant dense<0.000000e+00> : vector<16x256xf32>
    %2 = tpu.matmul %0, %1, %cst {dimension_numbers = #tpu.dot_dimension_numbers<[1], [0], [0], [1], [0, 0, 1, 1], [], []>} : vector<16x128xbf16>, vector<128x256xbf16>, vector<16x256xf32> -> vector<16x256xf32>
    %3 = vector.extract_strided_slice %2 {offsets = [0, 0], sizes = [16, 20], strides = [1, 1]} : vector<16x256xf32> to vector<16x20xf32>
    %4 = vector.extract_strided_slice %2 {offsets = [0, 20], sizes = [16, 20], strides = [1, 1]} : vector<16x256xf32> to vector<16x20xf32>
    %5 = arith.maximumf %3, %4 : vector<16x20xf32>
    %6 = vector.extract_strided_slice %2 {offsets = [0, 40], sizes = [16, 20], strides = [1, 1]} : vector<16x256xf32> to vector<16x20xf32>
    %7 = arith.maximumf %5, %6 : vector<16x20xf32>
    %8 = vector.extract_strided_slice %2 {offsets = [0, 60], sizes = [16, 20], strides = [1, 1]} : vector<16x256xf32> to vector<16x20xf32>
    %9 = arith.maximumf %7, %8 : vector<16x20xf32>
    %10 = vector.extract_strided_slice %2 {offsets = [0, 80], sizes = [16, 20], strides = [1, 1]} : vector<16x256xf32> to vector<16x20xf32>
    %11 = arith.maximumf %9, %10 : vector<16x20xf32>
    %12 = vector.extract_strided_slice %2 {offsets = [0, 100], sizes = [16, 20], strides = [1, 1]} : vector<16x256xf32> to vector<16x20xf32>
    %13 = arith.maximumf %11, %12 : vector<16x20xf32>
    %cst_3 = arith.constant 0.000000e+00 : f32
    %14 = vector.broadcast %cst_3 : f32 to vector<16x20xf32>
    %15 = arith.maximumf %13, %14 : vector<16x20xf32>
    %16 = arith.truncf %15 : vector<16x20xf32> to vector<16x20xbf16>
    %17 = vector.extract_strided_slice %2 {offsets = [0, 120], sizes = [16, 20], strides = [1, 1]} : vector<16x256xf32> to vector<16x20xf32>
    %18 = vector.extract_strided_slice %2 {offsets = [0, 140], sizes = [16, 20], strides = [1, 1]} : vector<16x256xf32> to vector<16x20xf32>
    %19 = arith.maximumf %17, %18 : vector<16x20xf32>
    %20 = vector.extract_strided_slice %2 {offsets = [0, 160], sizes = [16, 20], strides = [1, 1]} : vector<16x256xf32> to vector<16x20xf32>
    %21 = arith.maximumf %19, %20 : vector<16x20xf32>
    %22 = vector.extract_strided_slice %2 {offsets = [0, 180], sizes = [16, 20], strides = [1, 1]} : vector<16x256xf32> to vector<16x20xf32>
    %23 = arith.maximumf %21, %22 : vector<16x20xf32>
    %24 = vector.extract_strided_slice %2 {offsets = [0, 200], sizes = [16, 20], strides = [1, 1]} : vector<16x256xf32> to vector<16x20xf32>
    %25 = arith.maximumf %23, %24 : vector<16x20xf32>
    %cst_4 = arith.constant 0.000000e+00 : f32
    %26 = vector.broadcast %cst_4 : f32 to vector<16x20xf32>
    %27 = arith.maximumf %25, %26 : vector<16x20xf32>
    %28 = arith.truncf %27 : vector<16x20xf32> to vector<16x20xbf16>
    %c0_5 = arith.constant 0 : index
    %c0_6 = arith.constant 0 : index
    %29 = vector.load %arg3[%c0_5, %c0_6] : memref<20x128xbf16, #tpu.memory_space<vmem>>, vector<20x128xbf16>
    %cst_7 = arith.constant dense<0.000000e+00> : vector<16x128xf32>
    %30 = tpu.matmul %16, %29, %cst_7 {dimension_numbers = #tpu.dot_dimension_numbers<[1], [0], [0], [1], [0, 0, 1, 1], [], []>} : vector<16x20xbf16>, vector<20x128xbf16>, vector<16x128xf32> -> vector<16x128xf32>
    %c0_8 = arith.constant 0 : index
    %c0_9 = arith.constant 0 : index
    %31 = vector.load %arg4[%c0_8, %c0_9] : memref<20x128xbf16, #tpu.memory_space<vmem>>, vector<20x128xbf16>
    %cst_10 = arith.constant dense<0.000000e+00> : vector<16x128xf32>
    %32 = tpu.matmul %28, %31, %cst_10 {dimension_numbers = #tpu.dot_dimension_numbers<[1], [0], [0], [1], [0, 0, 1, 1], [], []>} : vector<16x20xbf16>, vector<20x128xbf16>, vector<16x128xf32> -> vector<16x128xf32>
    %33 = arith.addf %30, %32 : vector<16x128xf32>
    %c0_11 = arith.constant 0 : index
    %c0_12 = arith.constant 0 : index
    %34 = vector.load %arg5[%c0_11, %c0_12] : memref<1x128xf32, #tpu.memory_space<vmem>>, vector<1x128xf32>
    %35 = vector.broadcast %34 : vector<1x128xf32> to vector<16x128xf32>
    %36 = arith.addf %33, %35 : vector<16x128xf32>
    %cst_13 = arith.constant dense<0xFF800000> : vector<16xf32>
    %37 = vector.multi_reduction <maximumf>, %36, %cst_13 [1] : vector<16x128xf32> to vector<16xf32>
    %38 = vector.shape_cast %37 : vector<16xf32> to vector<16x1xf32>
    %39 = vector.broadcast %38 : vector<16x1xf32> to vector<16x128xf32>
    %40 = arith.subf %36, %39 : vector<16x128xf32>
    %41 = math.exp %40 : vector<16x128xf32>
    %cst_14 = arith.constant dense<0.000000e+00> : vector<16xf32>
    %42 = vector.multi_reduction <add>, %41, %cst_14 [1] : vector<16x128xf32> to vector<16xf32>
    %43 = vector.shape_cast %42 : vector<16xf32> to vector<16x1xf32>
    %44 = tpu.reciprocal %43 {approx = true} : vector<16x1xf32> -> vector<16x1xf32>
    %45 = vector.broadcast %44 : vector<16x1xf32> to vector<16x128xf32>
    %46 = arith.mulf %41, %45 : vector<16x128xf32>
    %c0_15 = arith.constant 0 : index
    %c0_16 = arith.constant 0 : index
    %47 = vector.load %arg6[%c0_15, %c0_16] : memref<16x128xf32, #tpu.memory_space<vmem>>, vector<16x128xf32>
    tpu.vector_store %arg6[%c0_15, %c0_16], %46 {strides = array<i32>} : memref<16x128xf32, #tpu.memory_space<vmem>>, vector<16x128xf32>,
    return
  }
  func.func @transform_0(%arg0: i32) -> (i32, i32) {
    %c0_i32 = arith.constant 0 : i32
    %c0_i32_0 = arith.constant 0 : i32
    return %arg0, %c0_i32 : i32, i32
  }
  func.func @transform_1(%arg0: i32) -> (i32, i32) {
    %c0_i32 = arith.constant 0 : i32
    %c0_i32_0 = arith.constant 0 : i32
    %c0_i32_1 = arith.constant 0 : i32
    return %c0_i32, %c0_i32_0 : i32, i32
  }
  func.func @transform_2(%arg0: i32) -> (i32, i32) {
    %c0_i32 = arith.constant 0 : i32
    %c0_i32_0 = arith.constant 0 : i32
    %c0_i32_1 = arith.constant 0 : i32
    return %c0_i32, %c0_i32_0 : i32, i32
  }
  func.func @transform_3(%arg0: i32) -> (i32, i32) {
    %c0_i32 = arith.constant 0 : i32
    %c0_i32_0 = arith.constant 0 : i32
    %c0_i32_1 = arith.constant 0 : i32
    return %c0_i32, %c0_i32_0 : i32, i32
  }
  func.func @transform_4(%arg0: i32) -> (i32, i32) {
    %c0_i32 = arith.constant 0 : i32
    %c0_i32_0 = arith.constant 0 : i32
    %c0_i32_1 = arith.constant 0 : i32
    return %c0_i32, %c0_i32_0 : i32, i32
  }
  func.func @transform_5(%arg0: i32) -> (i32, i32) {
    %c0_i32 = arith.constant 0 : i32
    %c0_i32_0 = arith.constant 0 : i32
    return %arg0, %c0_i32 : i32, i32
  }
}

</mosaic_0001>

<bundles_post_ra>
// kernel: cnn_forward.1
= control target key start
LH: loop header
LB: loop body
LE: loop exit
PB: predicated region body
PF: predicated region fallthrough
CT: control target
= control target key end

     0   :  { %v559_v1 = vmov 0   ;;  %s560_s27 = smov 68   ;;  %s562_s28 = smov 48   ;;  %v564_v24 = vmov 0.0   ;;  %vm288_vm0 = vcmask 1041408   ;;  %vm565_vm1 = vmmov 0   ;;  %s701_s1 = inlined_call_operand.vmem [shape: bf16[128,256], index: 1, kind: input, shape index: {}]   ;;  %s702_s0 = inlined_call_operand.vmem [shape: bf16[16,128], index: 0, kind: input, shape index: {}]   ;;  %s703_s3 = inlined_call_operand.vmem [shape: bf16[20,128], index: 3, kind: input, shape index: {}]   ;;  %s704_s2 = inlined_call_operand.vmem [shape: bf16[20,128], index: 2, kind: input, shape index: {}]   ;;  %s705_s4 = inlined_call_operand.vmem [shape: f32[1,128], index: 4, kind: input, shape index: {}]   ;;  %s706_s5 = inlined_call_operand.vmem [shape: f32[16,128], index: 5, kind: output, shape index: {}]  }
   0x1   :  { %v522_v0 = vld [vmem:[%s701_s1 + $0x4] ss:$8 sps:$4 sm:$0xff]   ;;  %157 = vmatprep.mubr.bf16.mxu0 %v559_v1  ;;  %v524_v2 = vld [vmem:[%s701_s1] ss:$8 sps:$4 sm:$0xff]   ;;  %v525_v3 = vld [vmem:[%s701_s1 + $0x14] ss:$8 sps:$4 sm:$0xff]   ;;  %452 = vmatprep.subr.bf16.mxu1 %v564_v24 }
   0x2   :  { %125 = vmatprep.subr.bf16.mxu0 %v522_v0  ;;  %v527_v4 = vld [vmem:[%s701_s1 + $0x10] ss:$8 sps:$4 sm:$0xff]   ;;  %v528_v5 = vld [vmem:[%s701_s1 + $0x24] ss:$8 sps:$4 sm:$0xff]   ;;  %v530_v6 = vld [vmem:[%s701_s1 + $0x20] ss:$8 sps:$4 sm:$0xff]   ;;  %456 = vmatprep.mubr.msk.bf16.mxu1 %vm565_vm1, %v564_v24 }
   0x3   :  { %126 = vmatpush1.bf16.msra.mxu0 %v524_v2  ;;  %v531_v7 = vld [vmem:[%s701_s1 + $0x34] ss:$8 sps:$4 sm:$0xff]   ;;  %v533_v8 = vld [vmem:[%s701_s1 + $0x30] ss:$8 sps:$4 sm:$0xff]   ;;  %v534_v9 = vld [vmem:[%s701_s1 + $0x44] ss:$8 sps:$4 sm:$0xff]  }
   0x4   :  { %127 = vmatprep.subr.bf16.mxu0 %v525_v3  ;;  %v536_v10 = vld [vmem:[%s701_s1 + $0x40] ss:$8 sps:$4 sm:$0xff]   ;;  %v537_v11 = vld [vmem:[%s701_s1 + $0x54] ss:$8 sps:$4 sm:$0xff]   ;;  %v539_v12 = vld [vmem:[%s701_s1 + $0x50] ss:$8 sps:$4 sm:$0xff]  }
   0x5   :  { %v540_v13 = vld [vmem:[%s701_s1 + $0x64] ss:$8 sps:$4 sm:$0xff]   ;;  %v542_v14 = vld [vmem:[%s701_s1 + $0x60] ss:$8 sps:$4 sm:$0xff]   ;;  %v543_v15 = vld [vmem:[%s701_s1 + $0x74] ss:$8 sps:$4 sm:$0xff]  }
   0x6   :  { %v545_v16 = vld [vmem:[%s701_s1 + $0x70] ss:$8 sps:$4 sm:$0xff]   ;;  %v546_v17 = vld [vmem:[%s702_s0] sm:$0xff]   ;;  %s561_s1 = smov 108   ;;  %s563_s0 = smov 88   ;;  %vm273_vm2 = vcmask 64512  }
   0x7   :  { %128 = vmatpush1.bf16.msra.mxu0 %v527_v4  ;;  %v547_v25 = vld [vmem:[%s703_s3] sm:$0xff]   ;;  %v548_v26 = vld [vmem:[%s703_s3 + $0x8] ss:$0 sps:$4 sm:$0x33]   ;;  %s566_s3 = smov 8   ;;  %s567_s8 = smov 28  }
   0x8   :  { %129 = vmatprep.subr.bf16.mxu0 %v528_v5  ;;  %453 = vmatpush3.bf16.msra.mxu1 %v547_v25  ;;  %v290_v27 = vsel %vm288_vm0, %v548_v26, 0  ;;  %vm284_vm3 = vcmask 162816  }
   0x9   :  { %454 = vmatprep.subr.bf16.mxu1 %v564_v24 }
   0xb   :  { %130 = vmatpush1.bf16.msra.mxu0 %v530_v6 }
   0xc   :  { %131 = vmatprep.subr.bf16.mxu0 %v531_v7  ;;  %455 = vmatpush3.bf16.msra.mxu1 %v290_v27 }
   0xd   :  { %460 = vmatprep.subr.bf16.mxu1 %v564_v24 }
   0xf   :  { %132 = vmatpush1.bf16.msra.mxu0 %v533_v8  ;;  %v549_v8 = vld [vmem:[%s704_s2] sm:$0xff]  }
  0x10   :  { %133 = vmatprep.subr.bf16.mxu0 %v534_v9 }
  0x13   :  { %134 = vmatpush1.bf16.msra.mxu0 %v536_v10 }
  0x14   :  { %135 = vmatprep.subr.bf16.mxu0 %v537_v11  ;;  %v550_v11 = vld [vmem:[%s704_s2 + $0x8] ss:$0 sps:$4 sm:$0x33]  }
  0x17   :  { %136 = vmatpush1.bf16.msra.mxu0 %v539_v12 }
  0x18   :  { %137 = vmatprep.subr.bf16.mxu0 %v540_v13 }
  0x1b   :  { %138 = vmatpush1.bf16.msra.mxu0 %v542_v14 }
  0x1c   :  { %139 = vmatprep.subr.bf16.mxu0 %v543_v15 }
  0x1f   :  { %140 = vmatpush1.bf16.msra.mxu0 %v545_v16 }
  0x22   :  { %158 = vmatmul.mubr.bf16.vlgmr.msra.gmra.mrb[0].mxu0 %v546_v17 }
  0xf5   :  { %v649_v18 = vpop.f32.mrb[0].mxu0 }
  0xf6   :  { %v161_v19 = vpop.f32.mrb[1].mxu0 }
  0xf7   :  { %v651_v20 = vpop.f32.mrb[2].mxu0 }
  0xf8   :  { %v165_v21 = vpop.f32.mrb[3].mxu0  ;;  %v655_v22 = vpack.i.bf16 %v651_v20, %v649_v18 }
  0xf9   :  { %v487_v23 = vpack.i.bf16 %v165_v21, %v161_v19 }
  0xfb   :  { %488 = vrot.lane.b32.xlu1 %v487_v23, %s560_s27  ;;  %478 = vrot.lane.b32.xlu0 %v487_v23, %s561_s1 }
  0xff   :  { %493 = vrot.lane.b32.xlu1 %v487_v23, %s562_s28  ;;  %483 = vrot.lane.b32.xlu0 %v487_v23, %s563_s0 }
 0x103   :  { %503 = vrot.lane.b32.xlu1 %v655_v22, %s563_s0  ;;  %498 = vrot.lane.b32.xlu0 %v655_v22, %s561_s1 }
 0x107   :  { %508 = vrot.lane.b32.xlu0 %v655_v22, %s560_s27 }
 0x16d   :  { %v489_v28 = vpop.permute.xlu1 %488  ;;  %v479_v29 = vpop.permute.xlu0 %478 }
 0x16e   :  { %v481_v30 = vunpack.i.h.bf16 %v479_v29  ;;  %v480_v31 = vunpack.i.l.bf16 %v479_v29  ;;  %v491_v40 = vunpack.i.h.bf16 %v489_v28  ;;  %v490_v41 = vunpack.i.l.bf16 %v489_v28 }
 0x170   :  { %v223_v32 = vmax.f32 %v651_v20, %v481_v30  ;;  %v224_v33 = vmax.f32 %v165_v21, %v481_v30  ;;  %v221_v35 = vmax.f32 %v649_v18, %v480_v31  ;;  %v222_v36 = vmax.f32 %v161_v19, %v480_v31 }
 0x171   :  { %v484_v34 = vpop.permute.xlu0 %483  ;;  %v494_v37 = vpop.permute.xlu1 %493 }
 0x172   :  { %v486_v38 = vunpack.i.h.bf16 %v484_v34  ;;  %v485_v39 = vunpack.i.l.bf16 %v484_v34  ;;  %v496_v46 = vunpack.i.h.bf16 %v494_v37  ;;  %v495_v47 = vunpack.i.l.bf16 %v494_v37  ;;  %v445_v37 = vld [vmem:[%s705_s4] ss:$0 sm:$0xff] }
 0x174   :  { %v231_v42 = vmax.f32 %v221_v35, %v485_v39  ;;  %v232_v43 = vmax.f32 %v222_v36, %v485_v39  ;;  %v233_v44 = vmax.f32 %v223_v32, %v486_v38  ;;  %v234_v45 = vmax.f32 %v224_v33, %v486_v38 }
 0x175   :  { %v499_v62 = vpop.permute.xlu0 %498  ;;  %v504_v2 = vpop.permute.xlu1 %503 }
 0x176   :  { %v241_v48 = vmax.f32 %v231_v42, %v490_v41  ;;  %v242_v49 = vmax.f32 %v232_v43, %v490_v41  ;;  %v243_v50 = vmax.f32 %v233_v44, %v491_v40  ;;  %v244_v51 = vmax.f32 %v234_v45, %v491_v40 }
 0x177   :  { %v501_v63 = vunpack.i.h.bf16 %v499_v62  ;;  %v500_v0 = vunpack.i.l.bf16 %v499_v62  ;;  %v506_v5 = vunpack.i.h.bf16 %v504_v2  ;;  %v505_v6 = vunpack.i.l.bf16 %v504_v2 }
 0x178   :  { %v252_v52 = vmax.f32 %v242_v49, %v495_v47  ;;  %v254_v53 = vmax.f32 %v244_v51, %v496_v46  ;;  %v251_v54 = vmax.f32 %v241_v48, %v495_v47  ;;  %v253_v55 = vmax.f32 %v243_v50, %v496_v46 }
 0x179   :  { %v509_v1 = vpop.permute.xlu0 %508  ;;  %v177_v3 = vmax.f32 %v651_v20, %v501_v63  ;;  %v176_v4 = vmax.f32 %v649_v18, %v500_v0  ;;  %v346_v18 = vsel %vm288_vm0, %v550_v11, 0 }
 0x17a   :  { %v256_v56 = vmax.f32 %v252_v52, 0.0  ;;  %v258_v57 = vmax.f32 %v254_v53, 0.0  ;;  %v255_v58 = vmax.f32 %v251_v54, 0.0  ;;  %v257_v59 = vmax.f32 %v253_v55, 0.0 }
 0x17b   :  { %v511_v9 = vunpack.i.h.bf16 %v509_v1  ;;  %v510_v12 = vunpack.i.l.bf16 %v509_v1  ;;  %v184_v13 = vmax.f32 %v176_v4, %v505_v6  ;;  %v185_v14 = vmax.f32 %v177_v3, %v506_v5 }
 0x17c   :  { %v260_v60 = vpack.c.bf16 %v258_v57, %v256_v56  ;;  %v259_v61 = vpack.c.bf16 %v257_v59, %v255_v58 }
 0x17d   :  { %v192_v19 = vmax.f32 %v184_v13, %v510_v12  ;;  %v193_v20 = vmax.f32 %v185_v14, %v511_v9 }
 0x17e   :  { %271 = vrot.lane.b32.xlu0 %v260_v60, %s566_s3  ;;  %269 = vrot.lane.b32.xlu1 %v259_v61, %s566_s3 }
 0x182   :  { %518 = vrot.lane.b32.xlu0 %v655_v22, %s567_s8  ;;  %513 = vrot.lane.b32.xlu1 %v655_v22, %s562_s28 }
 0x1f0   :  { %v272_v7 = vpop.permute.xlu0 %271  ;;  %v270_v10 = vpop.permute.xlu1 %269 }
 0x1f1   :  { %v274_v15 = vsel %vm273_vm2, %v270_v10, %v272_v7 }
 0x1f2   :  { %457 = vmatmul.mubr.msk.bf16.vlgmr.msra.gmra.mrb[0].mxu1 %vm284_vm3, %v274_v15 }
 0x1f3   :  { %461 = vmatpush3.bf16.msra.mxu1 %v549_v8  ;;  %464 = vmatprep.mubr.msk.bf16.mxu1 %vm565_vm1, %v564_v24 }
 0x1f4   :  { %v519_v16 = vpop.permute.xlu0 %518  ;;  %v514_v17 = vpop.permute.xlu1 %513  ;;  %462 = vmatprep.subr.bf16.mxu1 %v564_v24 }
 0x1f5   :  { %v516_v21 = vunpack.i.h.bf16 %v514_v17  ;;  %v515_v22 = vunpack.i.l.bf16 %v514_v17  ;;  %v521_v23 = vunpack.i.h.bf16 %v519_v16  ;;  %v520_v25 = vunpack.i.l.bf16 %v519_v16 }
 0x1f7   :  { %v201_v26 = vmax.f32 %v193_v20, %v516_v21  ;;  %v200_v27 = vmax.f32 %v192_v19, %v515_v22  ;;  %463 = vmatpush3.bf16.msra.mxu1 %v346_v18 }
 0x1f9   :  { %v209_v28 = vmax.f32 %v201_v26, %v521_v23  ;;  %v208_v29 = vmax.f32 %v200_v27, %v520_v25 }
 0x1fb   :  { %v211_v30 = vmax.f32 %v209_v28, 0.0  ;;  %v210_v31 = vmax.f32 %v208_v29, 0.0 }
 0x1fd   :  { %v212_v32 = vpack.c.bf16 %v211_v30, %v210_v31 }
 0x1ff   :  { %465 = vmatmul.mubr.msk.bf16.vlgmr.msra.gmra.mrb[4].mxu1 %vm284_vm3, %v212_v32 }
 0x2c5   :  { %v326_v33 = vpop.f32.mrb[0].mxu1 }
 0x2c6   :  { %v458_v24 = vpop.f32.mrb[1].mxu1 }
 0x2c7   :  { %v329_v34 = vpop.f32.mrb[2].mxu1 }
 0x2c8   :  { %v459_v35 = vpop.f32.mrb[3].mxu1 }
 0x2d2   :  { %v382_v36 = vpop.f32.mrb[4].mxu1 }
 0x2d3   :  { %v383_v38 = vadd.f32 %v382_v36, %v326_v33  ;;  %v466_v39 = vpop.f32.mrb[5].mxu1 }
 0x2d4   :  { %v385_v40 = vpop.f32.mrb[6].mxu1 }
 0x2d5   :  { %v386_v41 = vadd.f32 %v385_v40, %v329_v34  ;;  %v467_v42 = vpop.f32.mrb[7].mxu1  ;;  %v396_v43 = vadd.f32 %v445_v37, %v383_v38 }
 0x2d7   :  { %398 = vmax.xlane.f32.xlu1 %v396_v43  ;;  %v397_v44 = vadd.f32 %v445_v37, %v386_v41 }
 0x2d9   :  { %400 = vmax.xlane.f32.xlu0 %v397_v44 }
 0x364   :  { %v399_v45 = vpop.xlane.xlu1 %398 }
 0x365   :  { %v402_v46 = vsub.f32 %v396_v43, %v399_v45 }
 0x366   :  { %v401_v47 = vpop.xlane.xlu0 %400 }
 0x367   :  { %v404_v48 = vmul.f32 1.442695, %v402_v46  ;;  %v403_v49 = vsub.f32 %v397_v44, %v401_v47 }
 0x369   :  { %551 = vpow2.f32 %v404_v48  ;;  %v406_v50 = vmul.f32 1.442695, %v403_v49 }
 0x36b   :  { %553 = vpow2.f32 %v406_v50 }
 0x373   :  { %v552_v51 = vpop.eup %551 }
 0x374   :  { %408 = vadd.xlane.f32.xlu0 %v552_v51 }
 0x375   :  { %v554_v52 = vpop.eup %553 }
 0x376   :  { %410 = vadd.xlane.f32.xlu1 %v554_v52 }
 0x401   :  { %v409_v53 = vpop.xlane.xlu0 %408 }
 0x402   :  { %555 = vrcp.f32 %v409_v53 }
 0x403   :  { %v411_v54 = vpop.xlane.xlu1 %410 }
 0x404   :  { %557 = vrcp.f32 %v411_v54 }
 0x40c   :  { %v556_v55 = vpop.eup %555 }
 0x40d   :  { %v414_v56 = vmul.f32 %v556_v55, %v552_v51 }
 0x40e   :  { %v558_v57 = vpop.eup %557 }
 0x40f   :  { %416 = vst [vmem:[%s706_s5] sm:$0xff] %v414_v56  ;;  %v415_v58 = vmul.f32 %v558_v57, %v554_v52 }
 0x411   :  { %417 = vst [vmem:[%s706_s5 + $0x8] sm:$0xff] %v415_v58 }

</bundles_post_ra>
